<compile_context>
chip_gen: v6e
topology: v6e:2x2x1
jax: 0.10.0
libtpu: 0.0.40
codegen_flags: <defaults>
</compile_context>

<pallas_src>
import functools

import jax
import jax.numpy as jnp
import numpy as np
from jax import lax
from jax.experimental import pallas as pl
from jax.experimental.pallas import tpu as pltpu


def _gru_encoder_kernel(
    gi_ref,            # (T_blk, Bblk, 3H) bf16: streamed input projection (biases folded)
    whh_ref,           # (H, 3H) bf16: fused hidden weights, gate order (r, z, n)
    bhn_ref,           # (1, H)  f32: hidden bias of the n gate (applied inside r*(...))
    w1_ref, b1_ref,    # (H, 50), (1, 50) f32
    w2_ref, b2_ref,    # (50, 2L), (1, 2L) f32 (mean | std heads fused)
    out_ref,           # (Bblk, 2L) f32
    h_ref,             # (Bblk, H)  f32 VMEM scratch: hidden state carried across time blocks
):
    T_blk, Bblk, _ = gi_ref.shape
    H = whh_ref.shape[0]
    t_blk = pl.program_id(1)

    @pl.when(t_blk == 0)
    def _():
        h_ref[...] = jnp.zeros_like(h_ref)

    whh = whh_ref[...]                                # loaded once per block, loop-invariant
    bhn = jnp.broadcast_to(bhn_ref[...], (Bblk, H))   # hoisted broadcast (JAX won't CSE it)

    def sigmoid(x):
        # Exact identity: sigma(x) = 0.5*(tanh(x/2)+1) -> one EUP op on the serial path.
        return 0.5 * jnp.tanh(0.5 * x) + 0.5

    def gru_step(tt, h):
        # Ref-level gate slices: avoids loading (Bblk, 3H) and lane-slicing it in vregs.
        gi_r = gi_ref[tt, :, 0 * H:1 * H].astype(jnp.float32)
        gi_z = gi_ref[tt, :, 1 * H:2 * H].astype(jnp.float32)
        gi_n = gi_ref[tt, :, 2 * H:3 * H].astype(jnp.float32)
        # Single fused hidden-side gate matmul, bf16 inputs, f32 accumulate.
        gh = jnp.dot(h.astype(jnp.bfloat16), whh, preferred_element_type=jnp.float32)
        r = sigmoid(gi_r + gh[:, 0 * H:1 * H])
        z = sigmoid(gi_z + gh[:, 1 * H:2 * H])
        n = jnp.tanh(gi_n + r * (gh[:, 2 * H:3 * H] + bhn))
        return (1.0 - z) * n + z * h

    # Unroll as a function of Bblk: keeps live ranges inside the 64-vreg file (no spills)
    # while still letting the LLO scheduler overlap MXU/EUP latency across iterations.
    if Bblk >= 64:
        unroll = min(4, T_blk)
    elif T_blk <= 32:
        unroll = T_blk
    else:
        unroll = 8
    h_ref[...] = lax.fori_loop(0, T_blk, gru_step, h_ref[...], unroll=unroll)

    @pl.when(t_blk == pl.num_programs(1) - 1)
    def _():
        # hiddens_to_z0: Linear(H, 50) -> Tanh -> Linear(50, 2L) (mean|std fused head)
        hid = jnp.tanh(
            jnp.dot(h_ref[...], w1_ref[...], preferred_element_type=jnp.float32)
            + b1_ref[...]
        )
        out_ref[...] = (
            jnp.dot(hid, w2_ref[...], preferred_element_type=jnp.float32) + b2_ref[...]
        )


def _num_tensorcores():
    """Best-effort count of TensorCores per device (2 on v7x / megacore parts, else 1)."""
    try:
        dev = jax.local_devices()[0]
        if getattr(dev, "platform", "") != "tpu":
            return 1
        nc = getattr(dev, "num_cores", None)
        if isinstance(nc, int) and nc > 0:
            return nc
        kind = str(getattr(dev, "device_kind", "")).lower()
        return 2 if any(k in kind for k in ("v7", "v5p", "v4")) else 1
    except Exception:
        return 1


def _pick_time_block(T, block_b, hidden, bytes_per_elem=2, budget_bytes=8 << 20):
    """Largest divisor of T (<= 256) whose double-buffered gi chunk fits the budget."""
    per_step = 2 * block_b * 3 * hidden * bytes_per_elem   # double-buffered bytes per time step
    cap = max(1, min(256, T, budget_bytes // max(per_step, 1)))
    best = 1
    for tb in range(1, cap + 1):
        if T % tb == 0:
            best = tb
    return best


def init_params(key, input_dim, latent_dim, hidden_size, use_delta_t=True):
    """Deterministic parameter init mirroring the PyTorch module's shapes.

    GRU weights: PyTorch layout (3H, Din)/(3H, H), gate order (r, z, n),
    uniform(-1/sqrt(H), 1/sqrt(H)).  Linear layers: normal(0, 0.1) weights,
    zero biases (utils.init_network_weights).
    """
    gru_in = input_dim + (1 if use_delta_t else 0)
    H = hidden_size
    ks = jax.random.split(key, 8)
    bound = 1.0 / np.sqrt(H)
    u = lambda k, shape: jax.random.uniform(k, shape, jnp.float32, -bound, bound)
    params = {
        "weight_ih": u(ks[0], (3 * H, gru_in)),
        "weight_hh": u(ks[1], (3 * H, H)),
        "bias_ih": u(ks[2], (3 * H,)),
        "bias_hh": u(ks[3], (3 * H,)),
        "w1": 0.1 * jax.random.normal(ks[4], (50, H), jnp.float32),
        "b1": jnp.zeros((50,), jnp.float32),
        "w2": 0.1 * jax.random.normal(ks[5], (2 * latent_dim, 50), jnp.float32),
        "b2": jnp.zeros((2 * latent_dim,), jnp.float32),
    }
    return params


@functools.partial(jax.jit, static_argnames=("latent_dim", "use_delta_t", "run_backwards"))
def encoder_z0_rnn_forward(params, data, time_steps, latent_dim,
                           use_delta_t=True, run_backwards=True):
    """data: (n_traj, T, input_dim); time_steps: (T,).

    Returns (mean, std) each of shape (1, n_traj, latent_dim), matching PyTorch.
    """
    n_traj = data.shape[0]

    # --- glue (plain JAX): permute / reverse / delta_t concat --------------
    x = jnp.transpose(data, (1, 0, 2))            # (T, B, D)
    if run_backwards:
        x = x[::-1]
    if use_delta_t:
        delta_t = time_steps[1:] - time_steps[:-1]
        if run_backwards:
            delta_t = delta_t[::-1]
        delta_t = jnp.concatenate([delta_t, jnp.zeros((1,), x.dtype)])   # (T,)
        delta_t = jnp.broadcast_to(delta_t[:, None, None], (x.shape[0], n_traj, 1))
        x = jnp.concatenate([delta_t, x], axis=-1)  # (T, B, D+1)
    x = x.astype(jnp.float32)

    T, B, Din = x.shape
    H = params["weight_hh"].shape[1]
    L = latent_dim

    # --- weight prep: fused, matmul-ready slabs ----------------------------
    w_ih, w_hh = params["weight_ih"], params["weight_hh"]
    b_ih, b_hh = params["bias_ih"], params["bias_hh"]

    wih = w_ih.T                                                           # (Din, 3H)
    whh = w_hh.T.astype(jnp.bfloat16)                                      # (H, 3H) bf16
    # Fold b_ir+b_hr, b_iz+b_hz, b_in into the hoisted input projection bias.
    bih = jnp.concatenate([b_ih[: 2 * H] + b_hh[: 2 * H], b_ih[2 * H:]])   # (3H,)
    bhn = b_hh[2 * H:][None, :]                                            # (1, H)

    w1 = params["w1"].T                                                    # (H, 50)
    b1 = params["b1"][None, :]                                             # (1, 50)
    w2 = params["w2"].T                                                    # (50, 2L)
    b2 = params["b2"][None, :]                                             # (1, 2L)

    # --- hoisted, time-parallel input projection: one big GEMM, stored bf16 ----
    gi = (jnp.einsum("tbd,dh->tbh", x, wih) + bih).astype(jnp.bfloat16)    # (T, B, 3H)

    # --- batch split only where there is >1 TensorCore (v7x); keep nb=1 on v5e/v6e.
    n_tc = _num_tensorcores()
    if n_tc > 1 and B % (8 * n_tc) == 0:
        block_b = B // n_tc          # one batch block per TensorCore; stays multiple of 8
    else:
        block_b = B
    nb = B // block_b

    # --- stream gi over time: pick a T chunk that divides T and fits VMEM ------
    T_blk = _pick_time_block(T, block_b, H)
    nt = T // T_blk

    # --- explicit scoped-VMEM budget: gi chunk (x2 buffers) + weights + out + scratch
    gi_blk_bytes = T_blk * block_b * 3 * H * 2
    weight_bytes = (H * 3 * H) * 2 + 4 * (H + H * 50 + 50 + 50 * 2 * L + 2 * L)
    out_bytes = block_b * 2 * L * 4
    scratch_bytes = block_b * H * 4
    need = 2 * gi_blk_bytes + 2 * weight_bytes + 2 * out_bytes + scratch_bytes
    vmem_limit = int(min(max(2 * need + (4 << 20), 8 << 20), 48 << 20))

    cost = pl.CostEstimate(
        flops=2 * T * B * H * (3 * H) + 2 * B * H * 50 + 2 * B * 50 * (2 * L),
        transcendentals=3 * T * B * H + B * 50,
        bytes_accessed=(2 * T * B * 3 * H            # gi (bf16)
                        + 2 * H * 3 * H              # whh (bf16)
                        + 4 * (H + H * 50 + 50 + 50 * 2 * L + 2 * L + B * 2 * L)),
    )

    out = pl.pallas_call(
        _gru_encoder_kernel,
        out_shape=jax.ShapeDtypeStruct((B, 2 * L), jnp.float32),
        grid=(nb, nt),
        in_specs=[
            pl.BlockSpec((T_blk, block_b, 3 * H), lambda i, t: (t, i, 0)),  # gi (streamed over T)
            pl.BlockSpec((H, 3 * H), lambda i, t: (0, 0)),                  # whh
            pl.BlockSpec((1, H), lambda i, t: (0, 0)),                      # bhn
            pl.BlockSpec((H, 50), lambda i, t: (0, 0)),                     # w1
            pl.BlockSpec((1, 50), lambda i, t: (0, 0)),                     # b1
            pl.BlockSpec((50, 2 * L), lambda i, t: (0, 0)),                 # w2
            pl.BlockSpec((1, 2 * L), lambda i, t: (0, 0)),                  # b2
        ],
        out_specs=pl.BlockSpec((block_b, 2 * L), lambda i, t: (i, 0)),
        scratch_shapes=[pltpu.VMEM((block_b, H), jnp.float32)],             # carried hidden state
        compiler_params=pltpu.CompilerParams(
            dimension_semantics=("parallel", "arbitrary"),
            vmem_limit_bytes=vmem_limit,
        ),
        cost_estimate=cost,
    )(gi, whh, bhn, w1, b1, w2, b2)

    mean = out[:, :L]
    std = jnp.abs(out[:, L:])
    return mean[None], std[None]        # (1, B, L) each


def _reference_forward(params, data, time_steps, latent_dim,
                       use_delta_t=True, run_backwards=True):
    """Pure-JAX (f32) reference replicating PyTorch GRU semantics for validation."""
    x = jnp.transpose(data, (1, 0, 2))
    if run_backwards:
        x = x[::-1]
    if use_delta_t:
        dt = time_steps[1:] - time_steps[:-1]
        if run_backwards:
            dt = dt[::-1]
        dt = jnp.concatenate([dt, jnp.zeros((1,), x.dtype)])
        dt = jnp.broadcast_to(dt[:, None, None], (x.shape[0], x.shape[1], 1))
        x = jnp.concatenate([dt, x], axis=-1)
    H = params["weight_hh"].shape[1]
    w_ih, w_hh, b_ih, b_hh = (params["weight_ih"], params["weight_hh"],
                              params["bias_ih"], params["bias_hh"])

    def step(h, xt):
        gi = xt @ w_ih.T + b_ih
        gh = h @ w_hh.T + b_hh
        r = jax.nn.sigmoid(gi[:, :H] + gh[:, :H])
        z = jax.nn.sigmoid(gi[:, H:2 * H] + gh[:, H:2 * H])
        n = jnp.tanh(gi[:, 2 * H:] + r * gh[:, 2 * H:])
        h = (1 - z) * n + z * h
        return h, None

    h0 = jnp.zeros((x.shape[1], H), jnp.float32)
    h_last, _ = lax.scan(step, h0, x)
    hid = jnp.tanh(h_last @ params["w1"].T + params["b1"])
    out = hid @ params["w2"].T + params["b2"]
    mean, std = out[:, :latent_dim], jnp.abs(out[:, latent_dim:])
    return mean[None], std[None]


if __name__ == "__main__":
    # Small shapes consistent with the module's forward.
    n_traj, n_tp, input_dim = 4, 8, 4
    latent_dim, lstm_output_size = 16, 32

    key = jax.random.PRNGKey(0)
    k_data, k_time, k_params = jax.random.split(key, 3)
    data = jax.random.normal(k_data, (n_traj, n_tp, input_dim), jnp.float32)
    time_steps = jnp.sort(jax.random.uniform(k_time, (n_tp,), jnp.float32))
    params = init_params(k_params, input_dim, latent_dim, lstm_output_size)

    mean, std = encoder_z0_rnn_forward(params, data, time_steps, latent_dim)
    mean, std = jax.block_until_ready((mean, std))

    # gi / the recurrence matmul run in bf16 -> relaxed tolerance vs the f32 reference.
    ref_mean, ref_std = _reference_forward(params, data, time_steps, latent_dim)
    np.testing.assert_allclose(np.asarray(mean), np.asarray(ref_mean), rtol=3e-2, atol=3e-2)
    np.testing.assert_allclose(np.asarray(std), np.asarray(ref_std), rtol=3e-2, atol=3e-2)
    assert mean.shape == (1, n_traj, latent_dim) and std.shape == (1, n_traj, latent_dim)

    print("KERNEL_OK")
</pallas_src>

<mosaic_0001>
module attributes {stable_mosaic.version = 11 : i64} {
  func.func @_gru_encoder_kernel(%arg0: i32, %arg1: i32, %arg2: memref<8x4x96xbf16, #tpu.memory_space<vmem>>, %arg3: memref<32x96xbf16, #tpu.memory_space<vmem>>, %arg4: memref<1x32xf32, #tpu.memory_space<vmem>>, %arg5: memref<32x50xf32, #tpu.memory_space<vmem>>, %arg6: memref<1x50xf32, #tpu.memory_space<vmem>>, %arg7: memref<50x32xf32, #tpu.memory_space<vmem>>, %arg8: memref<1x32xf32, #tpu.memory_space<vmem>>, %arg9: memref<4x32xf32, #tpu.memory_space<vmem>>, %arg10: memref<4x32xf32, #tpu.memory_space<vmem>>) attributes {dimension_semantics = [#tpu.dimension_semantics<parallel>, #tpu.dimension_semantics<arbitrary>], iteration_bounds = array<i64: 1, 1>, scalar_prefetch = 0 : i64, scratch_operands = 1 : i64, tpu.core_type = #tpu.core_type<tc>, window_params = [{transform_indices = @transform_0, window_bounds = array<i64: 8, 4, 96>}, {pipeline_mode = #tpu.pipeline_mode<synchronous>, transform_indices = @transform_1, window_bounds = array<i64: 32, 96>}, {pipeline_mode = #tpu.pipeline_mode<synchronous>, transform_indices = @transform_2, window_bounds = array<i64: 1, 32>}, {pipeline_mode = #tpu.pipeline_mode<synchronous>, transform_indices = @transform_3, window_bounds = array<i64: 32, 50>}, {pipeline_mode = #tpu.pipeline_mode<synchronous>, transform_indices = @transform_4, window_bounds = array<i64: 1, 50>}, {pipeline_mode = #tpu.pipeline_mode<synchronous>, transform_indices = @transform_5, window_bounds = array<i64: 50, 32>}, {pipeline_mode = #tpu.pipeline_mode<synchronous>, transform_indices = @transform_6, window_bounds = array<i64: 1, 32>}, {transform_indices = @transform_7, window_bounds = array<i64: 4, 32>}]} {
    %c0_i32 = arith.constant 0 : i32
    %0 = arith.cmpi eq, %arg1, %c0_i32 : i32
    %1 = arith.extui %0 : i1 to i32
    %c0_i32_0 = arith.constant 0 : i32
    %2 = arith.cmpi ne, %1, %c0_i32_0 : i32
    scf.if %2 {
      %cst_120 = arith.constant 0.000000e+00 : f32
      %348 = vector.broadcast %cst_120 : f32 to vector<4x32xf32>
      %c0_121 = arith.constant 0 : index
      %c0_122 = arith.constant 0 : index
      %349 = vector.load %arg10[%c0_121, %c0_122] : memref<4x32xf32, #tpu.memory_space<vmem>>, vector<4x32xf32>
      tpu.vector_store %arg10[%c0_121, %c0_122], %348 {strides = array<i32>} : memref<4x32xf32, #tpu.memory_space<vmem>>, vector<4x32xf32>,
    } else {
    }
    %c0 = arith.constant 0 : index
    %c0_1 = arith.constant 0 : index
    %3 = vector.load %arg3[%c0, %c0_1] : memref<32x96xbf16, #tpu.memory_space<vmem>>, vector<32x96xbf16>
    %c0_2 = arith.constant 0 : index
    %c0_3 = arith.constant 0 : index
    %4 = vector.load %arg4[%c0_2, %c0_3] : memref<1x32xf32, #tpu.memory_space<vmem>>, vector<1x32xf32>
    %5 = vector.shape_cast %4 : vector<1x32xf32> to vector<1x32xf32>
    %6 = vector.broadcast %5 : vector<1x32xf32> to vector<4x32xf32>
    %c0_4 = arith.constant 0 : index
    %c0_5 = arith.constant 0 : index
    %7 = vector.load %arg10[%c0_4, %c0_5] : memref<4x32xf32, #tpu.memory_space<vmem>>, vector<4x32xf32>
    %c0_i32_6 = arith.constant 0 : i32
    %8 = arith.index_cast %c0_i32_6 : i32 to index
    %c0_7 = arith.constant 0 : index
    %c0_8 = arith.constant 0 : index
    %9 = vector.load %arg2[%8, %c0_7, %c0_8] : memref<8x4x96xbf16, #tpu.memory_space<vmem>>, vector<1x4x32xbf16>
    %10 = vector.shape_cast %9 : vector<1x4x32xbf16> to vector<4x32xbf16>
    %11 = arith.extf %10 : vector<4x32xbf16> to vector<4x32xf32>
    %12 = arith.index_cast %c0_i32_6 : i32 to index
    %c0_9 = arith.constant 0 : index
    %c32 = arith.constant 32 : index
    %13 = vector.load %arg2[%12, %c0_9, %c32] : memref<8x4x96xbf16, #tpu.memory_space<vmem>>, vector<1x4x32xbf16>
    %14 = vector.shape_cast %13 : vector<1x4x32xbf16> to vector<4x32xbf16>
    %15 = arith.extf %14 : vector<4x32xbf16> to vector<4x32xf32>
    %16 = arith.index_cast %c0_i32_6 : i32 to index
    %c0_10 = arith.constant 0 : index
    %c64 = arith.constant 64 : index
    %17 = vector.load %arg2[%16, %c0_10, %c64] : memref<8x4x96xbf16, #tpu.memory_space<vmem>>, vector<1x4x32xbf16>
    %18 = vector.shape_cast %17 : vector<1x4x32xbf16> to vector<4x32xbf16>
    %19 = arith.extf %18 : vector<4x32xbf16> to vector<4x32xf32>
    %20 = arith.truncf %7 : vector<4x32xf32> to vector<4x32xbf16>
    %cst = arith.constant dense<0.000000e+00> : vector<4x96xf32>
    %21 = tpu.matmul %20, %3, %cst {dimension_numbers = #tpu.dot_dimension_numbers<[1], [0], [0], [1], [0, 0, 1, 1], [], []>} : vector<4x32xbf16>, vector<32x96xbf16>, vector<4x96xf32> -> vector<4x96xf32>
    %22 = vector.extract_strided_slice %21 {offsets = [0, 0], sizes = [4, 32], strides = [1, 1]} : vector<4x96xf32> to vector<4x32xf32>
    %23 = arith.addf %11, %22 : vector<4x32xf32>
    %cst_11 = arith.constant 5.000000e-01 : f32
    %24 = vector.broadcast %cst_11 : f32 to vector<4x32xf32>
    %25 = arith.mulf %24, %23 : vector<4x32xf32>
    %26 = math.tanh %25 : vector<4x32xf32>
    %cst_12 = arith.constant 5.000000e-01 : f32
    %27 = vector.broadcast %cst_12 : f32 to vector<4x32xf32>
    %28 = arith.mulf %27, %26 : vector<4x32xf32>
    %cst_13 = arith.constant 5.000000e-01 : f32
    %29 = vector.broadcast %cst_13 : f32 to vector<4x32xf32>
    %30 = arith.addf %28, %29 : vector<4x32xf32>
    %31 = vector.extract_strided_slice %21 {offsets = [0, 32], sizes = [4, 32], strides = [1, 1]} : vector<4x96xf32> to vector<4x32xf32>
    %32 = arith.addf %15, %31 : vector<4x32xf32>
    %cst_14 = arith.constant 5.000000e-01 : f32
    %33 = vector.broadcast %cst_14 : f32 to vector<4x32xf32>
    %34 = arith.mulf %33, %32 : vector<4x32xf32>
    %35 = math.tanh %34 : vector<4x32xf32>
    %cst_15 = arith.constant 5.000000e-01 : f32
    %36 = vector.broadcast %cst_15 : f32 to vector<4x32xf32>
    %37 = arith.mulf %36, %35 : vector<4x32xf32>
    %cst_16 = arith.constant 5.000000e-01 : f32
    %38 = vector.broadcast %cst_16 : f32 to vector<4x32xf32>
    %39 = arith.addf %37, %38 : vector<4x32xf32>
    %40 = vector.extract_strided_slice %21 {offsets = [0, 64], sizes = [4, 32], strides = [1, 1]} : vector<4x96xf32> to vector<4x32xf32>
    %41 = arith.addf %40, %6 : vector<4x32xf32>
    %42 = arith.mulf %30, %41 : vector<4x32xf32>
    %43 = arith.addf %19, %42 : vector<4x32xf32>
    %44 = math.tanh %43 : vector<4x32xf32>
    %cst_17 = arith.constant 1.000000e+00 : f32
    %45 = vector.broadcast %cst_17 : f32 to vector<4x32xf32>
    %46 = arith.subf %45, %39 : vector<4x32xf32>
    %47 = arith.mulf %46, %44 : vector<4x32xf32>
    %48 = arith.mulf %39, %7 : vector<4x32xf32>
    %49 = arith.addf %47, %48 : vector<4x32xf32>
    %c1_i32 = arith.constant 1 : i32
    %50 = arith.index_cast %c1_i32 : i32 to index
    %c0_18 = arith.constant 0 : index
    %c0_19 = arith.constant 0 : index
    %51 = vector.load %arg2[%50, %c0_18, %c0_19] : memref<8x4x96xbf16, #tpu.memory_space<vmem>>, vector<1x4x32xbf16>
    %52 = vector.shape_cast %51 : vector<1x4x32xbf16> to vector<4x32xbf16>
    %53 = arith.extf %52 : vector<4x32xbf16> to vector<4x32xf32>
    %54 = arith.index_cast %c1_i32 : i32 to index
    %c0_20 = arith.constant 0 : index
    %c32_21 = arith.constant 32 : index
    %55 = vector.load %arg2[%54, %c0_20, %c32_21] : memref<8x4x96xbf16, #tpu.memory_space<vmem>>, vector<1x4x32xbf16>
    %56 = vector.shape_cast %55 : vector<1x4x32xbf16> to vector<4x32xbf16>
    %57 = arith.extf %56 : vector<4x32xbf16> to vector<4x32xf32>
    %58 = arith.index_cast %c1_i32 : i32 to index
    %c0_22 = arith.constant 0 : index
    %c64_23 = arith.constant 64 : index
    %59 = vector.load %arg2[%58, %c0_22, %c64_23] : memref<8x4x96xbf16, #tpu.memory_space<vmem>>, vector<1x4x32xbf16>
    %60 = vector.shape_cast %59 : vector<1x4x32xbf16> to vector<4x32xbf16>
    %61 = arith.extf %60 : vector<4x32xbf16> to vector<4x32xf32>
    %62 = arith.truncf %49 : vector<4x32xf32> to vector<4x32xbf16>
    %cst_24 = arith.constant dense<0.000000e+00> : vector<4x96xf32>
    %63 = tpu.matmul %62, %3, %cst_24 {dimension_numbers = #tpu.dot_dimension_numbers<[1], [0], [0], [1], [0, 0, 1, 1], [], []>} : vector<4x32xbf16>, vector<32x96xbf16>, vector<4x96xf32> -> vector<4x96xf32>
    %64 = vector.extract_strided_slice %63 {offsets = [0, 0], sizes = [4, 32], strides = [1, 1]} : vector<4x96xf32> to vector<4x32xf32>
    %65 = arith.addf %53, %64 : vector<4x32xf32>
    %cst_25 = arith.constant 5.000000e-01 : f32
    %66 = vector.broadcast %cst_25 : f32 to vector<4x32xf32>
    %67 = arith.mulf %66, %65 : vector<4x32xf32>
    %68 = math.tanh %67 : vector<4x32xf32>
    %cst_26 = arith.constant 5.000000e-01 : f32
    %69 = vector.broadcast %cst_26 : f32 to vector<4x32xf32>
    %70 = arith.mulf %69, %68 : vector<4x32xf32>
    %cst_27 = arith.constant 5.000000e-01 : f32
    %71 = vector.broadcast %cst_27 : f32 to vector<4x32xf32>
    %72 = arith.addf %70, %71 : vector<4x32xf32>
    %73 = vector.extract_strided_slice %63 {offsets = [0, 32], sizes = [4, 32], strides = [1, 1]} : vector<4x96xf32> to vector<4x32xf32>
    %74 = arith.addf %57, %73 : vector<4x32xf32>
    %cst_28 = arith.constant 5.000000e-01 : f32
    %75 = vector.broadcast %cst_28 : f32 to vector<4x32xf32>
    %76 = arith.mulf %75, %74 : vector<4x32xf32>
    %77 = math.tanh %76 : vector<4x32xf32>
    %cst_29 = arith.constant 5.000000e-01 : f32
    %78 = vector.broadcast %cst_29 : f32 to vector<4x32xf32>
    %79 = arith.mulf %78, %77 : vector<4x32xf32>
    %cst_30 = arith.constant 5.000000e-01 : f32
    %80 = vector.broadcast %cst_30 : f32 to vector<4x32xf32>
    %81 = arith.addf %79, %80 : vector<4x32xf32>
    %82 = vector.extract_strided_slice %63 {offsets = [0, 64], sizes = [4, 32], strides = [1, 1]} : vector<4x96xf32> to vector<4x32xf32>
    %83 = arith.addf %82, %6 : vector<4x32xf32>
    %84 = arith.mulf %72, %83 : vector<4x32xf32>
    %85 = arith.addf %61, %84 : vector<4x32xf32>
    %86 = math.tanh %85 : vector<4x32xf32>
    %cst_31 = arith.constant 1.000000e+00 : f32
    %87 = vector.broadcast %cst_31 : f32 to vector<4x32xf32>
    %88 = arith.subf %87, %81 : vector<4x32xf32>
    %89 = arith.mulf %88, %86 : vector<4x32xf32>
    %90 = arith.mulf %81, %49 : vector<4x32xf32>
    %91 = arith.addf %89, %90 : vector<4x32xf32>
    %c2_i32 = arith.constant 2 : i32
    %92 = arith.index_cast %c2_i32 : i32 to index
    %c0_32 = arith.constant 0 : index
    %c0_33 = arith.constant 0 : index
    %93 = vector.load %arg2[%92, %c0_32, %c0_33] : memref<8x4x96xbf16, #tpu.memory_space<vmem>>, vector<1x4x32xbf16>
    %94 = vector.shape_cast %93 : vector<1x4x32xbf16> to vector<4x32xbf16>
    %95 = arith.extf %94 : vector<4x32xbf16> to vector<4x32xf32>
    %96 = arith.index_cast %c2_i32 : i32 to index
    %c0_34 = arith.constant 0 : index
    %c32_35 = arith.constant 32 : index
    %97 = vector.load %arg2[%96, %c0_34, %c32_35] : memref<8x4x96xbf16, #tpu.memory_space<vmem>>, vector<1x4x32xbf16>
    %98 = vector.shape_cast %97 : vector<1x4x32xbf16> to vector<4x32xbf16>
    %99 = arith.extf %98 : vector<4x32xbf16> to vector<4x32xf32>
    %100 = arith.index_cast %c2_i32 : i32 to index
    %c0_36 = arith.constant 0 : index
    %c64_37 = arith.constant 64 : index
    %101 = vector.load %arg2[%100, %c0_36, %c64_37] : memref<8x4x96xbf16, #tpu.memory_space<vmem>>, vector<1x4x32xbf16>
    %102 = vector.shape_cast %101 : vector<1x4x32xbf16> to vector<4x32xbf16>
    %103 = arith.extf %102 : vector<4x32xbf16> to vector<4x32xf32>
    %104 = arith.truncf %91 : vector<4x32xf32> to vector<4x32xbf16>
    %cst_38 = arith.constant dense<0.000000e+00> : vector<4x96xf32>
    %105 = tpu.matmul %104, %3, %cst_38 {dimension_numbers = #tpu.dot_dimension_numbers<[1], [0], [0], [1], [0, 0, 1, 1], [], []>} : vector<4x32xbf16>, vector<32x96xbf16>, vector<4x96xf32> -> vector<4x96xf32>
    %106 = vector.extract_strided_slice %105 {offsets = [0, 0], sizes = [4, 32], strides = [1, 1]} : vector<4x96xf32> to vector<4x32xf32>
    %107 = arith.addf %95, %106 : vector<4x32xf32>
    %cst_39 = arith.constant 5.000000e-01 : f32
    %108 = vector.broadcast %cst_39 : f32 to vector<4x32xf32>
    %109 = arith.mulf %108, %107 : vector<4x32xf32>
    %110 = math.tanh %109 : vector<4x32xf32>
    %cst_40 = arith.constant 5.000000e-01 : f32
    %111 = vector.broadcast %cst_40 : f32 to vector<4x32xf32>
    %112 = arith.mulf %111, %110 : vector<4x32xf32>
    %cst_41 = arith.constant 5.000000e-01 : f32
    %113 = vector.broadcast %cst_41 : f32 to vector<4x32xf32>
    %114 = arith.addf %112, %113 : vector<4x32xf32>
    %115 = vector.extract_strided_slice %105 {offsets = [0, 32], sizes = [4, 32], strides = [1, 1]} : vector<4x96xf32> to vector<4x32xf32>
    %116 = arith.addf %99, %115 : vector<4x32xf32>
    %cst_42 = arith.constant 5.000000e-01 : f32
    %117 = vector.broadcast %cst_42 : f32 to vector<4x32xf32>
    %118 = arith.mulf %117, %116 : vector<4x32xf32>
    %119 = math.tanh %118 : vector<4x32xf32>
    %cst_43 = arith.constant 5.000000e-01 : f32
    %120 = vector.broadcast %cst_43 : f32 to vector<4x32xf32>
    %121 = arith.mulf %120, %119 : vector<4x32xf32>
    %cst_44 = arith.constant 5.000000e-01 : f32
    %122 = vector.broadcast %cst_44 : f32 to vector<4x32xf32>
    %123 = arith.addf %121, %122 : vector<4x32xf32>
    %124 = vector.extract_strided_slice %105 {offsets = [0, 64], sizes = [4, 32], strides = [1, 1]} : vector<4x96xf32> to vector<4x32xf32>
    %125 = arith.addf %124, %6 : vector<4x32xf32>
    %126 = arith.mulf %114, %125 : vector<4x32xf32>
    %127 = arith.addf %103, %126 : vector<4x32xf32>
    %128 = math.tanh %127 : vector<4x32xf32>
    %cst_45 = arith.constant 1.000000e+00 : f32
    %129 = vector.broadcast %cst_45 : f32 to vector<4x32xf32>
    %130 = arith.subf %129, %123 : vector<4x32xf32>
    %131 = arith.mulf %130, %128 : vector<4x32xf32>
    %132 = arith.mulf %123, %91 : vector<4x32xf32>
    %133 = arith.addf %131, %132 : vector<4x32xf32>
    %c3_i32 = arith.constant 3 : i32
    %134 = arith.index_cast %c3_i32 : i32 to index
    %c0_46 = arith.constant 0 : index
    %c0_47 = arith.constant 0 : index
    %135 = vector.load %arg2[%134, %c0_46, %c0_47] : memref<8x4x96xbf16, #tpu.memory_space<vmem>>, vector<1x4x32xbf16>
    %136 = vector.shape_cast %135 : vector<1x4x32xbf16> to vector<4x32xbf16>
    %137 = arith.extf %136 : vector<4x32xbf16> to vector<4x32xf32>
    %138 = arith.index_cast %c3_i32 : i32 to index
    %c0_48 = arith.constant 0 : index
    %c32_49 = arith.constant 32 : index
    %139 = vector.load %arg2[%138, %c0_48, %c32_49] : memref<8x4x96xbf16, #tpu.memory_space<vmem>>, vector<1x4x32xbf16>
    %140 = vector.shape_cast %139 : vector<1x4x32xbf16> to vector<4x32xbf16>
    %141 = arith.extf %140 : vector<4x32xbf16> to vector<4x32xf32>
    %142 = arith.index_cast %c3_i32 : i32 to index
    %c0_50 = arith.constant 0 : index
    %c64_51 = arith.constant 64 : index
    %143 = vector.load %arg2[%142, %c0_50, %c64_51] : memref<8x4x96xbf16, #tpu.memory_space<vmem>>, vector<1x4x32xbf16>
    %144 = vector.shape_cast %143 : vector<1x4x32xbf16> to vector<4x32xbf16>
    %145 = arith.extf %144 : vector<4x32xbf16> to vector<4x32xf32>
    %146 = arith.truncf %133 : vector<4x32xf32> to vector<4x32xbf16>
    %cst_52 = arith.constant dense<0.000000e+00> : vector<4x96xf32>
    %147 = tpu.matmul %146, %3, %cst_52 {dimension_numbers = #tpu.dot_dimension_numbers<[1], [0], [0], [1], [0, 0, 1, 1], [], []>} : vector<4x32xbf16>, vector<32x96xbf16>, vector<4x96xf32> -> vector<4x96xf32>
    %148 = vector.extract_strided_slice %147 {offsets = [0, 0], sizes = [4, 32], strides = [1, 1]} : vector<4x96xf32> to vector<4x32xf32>
    %149 = arith.addf %137, %148 : vector<4x32xf32>
    %cst_53 = arith.constant 5.000000e-01 : f32
    %150 = vector.broadcast %cst_53 : f32 to vector<4x32xf32>
    %151 = arith.mulf %150, %149 : vector<4x32xf32>
    %152 = math.tanh %151 : vector<4x32xf32>
    %cst_54 = arith.constant 5.000000e-01 : f32
    %153 = vector.broadcast %cst_54 : f32 to vector<4x32xf32>
    %154 = arith.mulf %153, %152 : vector<4x32xf32>
    %cst_55 = arith.constant 5.000000e-01 : f32
    %155 = vector.broadcast %cst_55 : f32 to vector<4x32xf32>
    %156 = arith.addf %154, %155 : vector<4x32xf32>
    %157 = vector.extract_strided_slice %147 {offsets = [0, 32], sizes = [4, 32], strides = [1, 1]} : vector<4x96xf32> to vector<4x32xf32>
    %158 = arith.addf %141, %157 : vector<4x32xf32>
    %cst_56 = arith.constant 5.000000e-01 : f32
    %159 = vector.broadcast %cst_56 : f32 to vector<4x32xf32>
    %160 = arith.mulf %159, %158 : vector<4x32xf32>
    %161 = math.tanh %160 : vector<4x32xf32>
    %cst_57 = arith.constant 5.000000e-01 : f32
    %162 = vector.broadcast %cst_57 : f32 to vector<4x32xf32>
    %163 = arith.mulf %162, %161 : vector<4x32xf32>
    %cst_58 = arith.constant 5.000000e-01 : f32
    %164 = vector.broadcast %cst_58 : f32 to vector<4x32xf32>
    %165 = arith.addf %163, %164 : vector<4x32xf32>
    %166 = vector.extract_strided_slice %147 {offsets = [0, 64], sizes = [4, 32], strides = [1, 1]} : vector<4x96xf32> to vector<4x32xf32>
    %167 = arith.addf %166, %6 : vector<4x32xf32>
    %168 = arith.mulf %156, %167 : vector<4x32xf32>
    %169 = arith.addf %145, %168 : vector<4x32xf32>
    %170 = math.tanh %169 : vector<4x32xf32>
    %cst_59 = arith.constant 1.000000e+00 : f32
    %171 = vector.broadcast %cst_59 : f32 to vector<4x32xf32>
    %172 = arith.subf %171, %165 : vector<4x32xf32>
    %173 = arith.mulf %172, %170 : vector<4x32xf32>
    %174 = arith.mulf %165, %133 : vector<4x32xf32>
    %175 = arith.addf %173, %174 : vector<4x32xf32>
    %c4_i32 = arith.constant 4 : i32
    %176 = arith.index_cast %c4_i32 : i32 to index
    %c0_60 = arith.constant 0 : index
    %c0_61 = arith.constant 0 : index
    %177 = vector.load %arg2[%176, %c0_60, %c0_61] : memref<8x4x96xbf16, #tpu.memory_space<vmem>>, vector<1x4x32xbf16>
    %178 = vector.shape_cast %177 : vector<1x4x32xbf16> to vector<4x32xbf16>
    %179 = arith.extf %178 : vector<4x32xbf16> to vector<4x32xf32>
    %180 = arith.index_cast %c4_i32 : i32 to index
    %c0_62 = arith.constant 0 : index
    %c32_63 = arith.constant 32 : index
    %181 = vector.load %arg2[%180, %c0_62, %c32_63] : memref<8x4x96xbf16, #tpu.memory_space<vmem>>, vector<1x4x32xbf16>
    %182 = vector.shape_cast %181 : vector<1x4x32xbf16> to vector<4x32xbf16>
    %183 = arith.extf %182 : vector<4x32xbf16> to vector<4x32xf32>
    %184 = arith.index_cast %c4_i32 : i32 to index
    %c0_64 = arith.constant 0 : index
    %c64_65 = arith.constant 64 : index
    %185 = vector.load %arg2[%184, %c0_64, %c64_65] : memref<8x4x96xbf16, #tpu.memory_space<vmem>>, vector<1x4x32xbf16>
    %186 = vector.shape_cast %185 : vector<1x4x32xbf16> to vector<4x32xbf16>
    %187 = arith.extf %186 : vector<4x32xbf16> to vector<4x32xf32>
    %188 = arith.truncf %175 : vector<4x32xf32> to vector<4x32xbf16>
    %cst_66 = arith.constant dense<0.000000e+00> : vector<4x96xf32>
    %189 = tpu.matmul %188, %3, %cst_66 {dimension_numbers = #tpu.dot_dimension_numbers<[1], [0], [0], [1], [0, 0, 1, 1], [], []>} : vector<4x32xbf16>, vector<32x96xbf16>, vector<4x96xf32> -> vector<4x96xf32>
    %190 = vector.extract_strided_slice %189 {offsets = [0, 0], sizes = [4, 32], strides = [1, 1]} : vector<4x96xf32> to vector<4x32xf32>
    %191 = arith.addf %179, %190 : vector<4x32xf32>
    %cst_67 = arith.constant 5.000000e-01 : f32
    %192 = vector.broadcast %cst_67 : f32 to vector<4x32xf32>
    %193 = arith.mulf %192, %191 : vector<4x32xf32>
    %194 = math.tanh %193 : vector<4x32xf32>
    %cst_68 = arith.constant 5.000000e-01 : f32
    %195 = vector.broadcast %cst_68 : f32 to vector<4x32xf32>
    %196 = arith.mulf %195, %194 : vector<4x32xf32>
    %cst_69 = arith.constant 5.000000e-01 : f32
    %197 = vector.broadcast %cst_69 : f32 to vector<4x32xf32>
    %198 = arith.addf %196, %197 : vector<4x32xf32>
    %199 = vector.extract_strided_slice %189 {offsets = [0, 32], sizes = [4, 32], strides = [1, 1]} : vector<4x96xf32> to vector<4x32xf32>
    %200 = arith.addf %183, %199 : vector<4x32xf32>
    %cst_70 = arith.constant 5.000000e-01 : f32
    %201 = vector.broadcast %cst_70 : f32 to vector<4x32xf32>
    %202 = arith.mulf %201, %200 : vector<4x32xf32>
    %203 = math.tanh %202 : vector<4x32xf32>
    %cst_71 = arith.constant 5.000000e-01 : f32
    %204 = vector.broadcast %cst_71 : f32 to vector<4x32xf32>
    %205 = arith.mulf %204, %203 : vector<4x32xf32>
    %cst_72 = arith.constant 5.000000e-01 : f32
    %206 = vector.broadcast %cst_72 : f32 to vector<4x32xf32>
    %207 = arith.addf %205, %206 : vector<4x32xf32>
    %208 = vector.extract_strided_slice %189 {offsets = [0, 64], sizes = [4, 32], strides = [1, 1]} : vector<4x96xf32> to vector<4x32xf32>
    %209 = arith.addf %208, %6 : vector<4x32xf32>
    %210 = arith.mulf %198, %209 : vector<4x32xf32>
    %211 = arith.addf %187, %210 : vector<4x32xf32>
    %212 = math.tanh %211 : vector<4x32xf32>
    %cst_73 = arith.constant 1.000000e+00 : f32
    %213 = vector.broadcast %cst_73 : f32 to vector<4x32xf32>
    %214 = arith.subf %213, %207 : vector<4x32xf32>
    %215 = arith.mulf %214, %212 : vector<4x32xf32>
    %216 = arith.mulf %207, %175 : vector<4x32xf32>
    %217 = arith.addf %215, %216 : vector<4x32xf32>
    %c5_i32 = arith.constant 5 : i32
    %218 = arith.index_cast %c5_i32 : i32 to index
    %c0_74 = arith.constant 0 : index
    %c0_75 = arith.constant 0 : index
    %219 = vector.load %arg2[%218, %c0_74, %c0_75] : memref<8x4x96xbf16, #tpu.memory_space<vmem>>, vector<1x4x32xbf16>
    %220 = vector.shape_cast %219 : vector<1x4x32xbf16> to vector<4x32xbf16>
    %221 = arith.extf %220 : vector<4x32xbf16> to vector<4x32xf32>
    %222 = arith.index_cast %c5_i32 : i32 to index
    %c0_76 = arith.constant 0 : index
    %c32_77 = arith.constant 32 : index
    %223 = vector.load %arg2[%222, %c0_76, %c32_77] : memref<8x4x96xbf16, #tpu.memory_space<vmem>>, vector<1x4x32xbf16>
    %224 = vector.shape_cast %223 : vector<1x4x32xbf16> to vector<4x32xbf16>
    %225 = arith.extf %224 : vector<4x32xbf16> to vector<4x32xf32>
    %226 = arith.index_cast %c5_i32 : i32 to index
    %c0_78 = arith.constant 0 : index
    %c64_79 = arith.constant 64 : index
    %227 = vector.load %arg2[%226, %c0_78, %c64_79] : memref<8x4x96xbf16, #tpu.memory_space<vmem>>, vector<1x4x32xbf16>
    %228 = vector.shape_cast %227 : vector<1x4x32xbf16> to vector<4x32xbf16>
    %229 = arith.extf %228 : vector<4x32xbf16> to vector<4x32xf32>
    %230 = arith.truncf %217 : vector<4x32xf32> to vector<4x32xbf16>
    %cst_80 = arith.constant dense<0.000000e+00> : vector<4x96xf32>
    %231 = tpu.matmul %230, %3, %cst_80 {dimension_numbers = #tpu.dot_dimension_numbers<[1], [0], [0], [1], [0, 0, 1, 1], [], []>} : vector<4x32xbf16>, vector<32x96xbf16>, vector<4x96xf32> -> vector<4x96xf32>
    %232 = vector.extract_strided_slice %231 {offsets = [0, 0], sizes = [4, 32], strides = [1, 1]} : vector<4x96xf32> to vector<4x32xf32>
    %233 = arith.addf %221, %232 : vector<4x32xf32>
    %cst_81 = arith.constant 5.000000e-01 : f32
    %234 = vector.broadcast %cst_81 : f32 to vector<4x32xf32>
    %235 = arith.mulf %234, %233 : vector<4x32xf32>
    %236 = math.tanh %235 : vector<4x32xf32>
    %cst_82 = arith.constant 5.000000e-01 : f32
    %237 = vector.broadcast %cst_82 : f32 to vector<4x32xf32>
    %238 = arith.mulf %237, %236 : vector<4x32xf32>
    %cst_83 = arith.constant 5.000000e-01 : f32
    %239 = vector.broadcast %cst_83 : f32 to vector<4x32xf32>
    %240 = arith.addf %238, %239 : vector<4x32xf32>
    %241 = vector.extract_strided_slice %231 {offsets = [0, 32], sizes = [4, 32], strides = [1, 1]} : vector<4x96xf32> to vector<4x32xf32>
    %242 = arith.addf %225, %241 : vector<4x32xf32>
    %cst_84 = arith.constant 5.000000e-01 : f32
    %243 = vector.broadcast %cst_84 : f32 to vector<4x32xf32>
    %244 = arith.mulf %243, %242 : vector<4x32xf32>
    %245 = math.tanh %244 : vector<4x32xf32>
    %cst_85 = arith.constant 5.000000e-01 : f32
    %246 = vector.broadcast %cst_85 : f32 to vector<4x32xf32>
    %247 = arith.mulf %246, %245 : vector<4x32xf32>
    %cst_86 = arith.constant 5.000000e-01 : f32
    %248 = vector.broadcast %cst_86 : f32 to vector<4x32xf32>
    %249 = arith.addf %247, %248 : vector<4x32xf32>
    %250 = vector.extract_strided_slice %231 {offsets = [0, 64], sizes = [4, 32], strides = [1, 1]} : vector<4x96xf32> to vector<4x32xf32>
    %251 = arith.addf %250, %6 : vector<4x32xf32>
    %252 = arith.mulf %240, %251 : vector<4x32xf32>
    %253 = arith.addf %229, %252 : vector<4x32xf32>
    %254 = math.tanh %253 : vector<4x32xf32>
    %cst_87 = arith.constant 1.000000e+00 : f32
    %255 = vector.broadcast %cst_87 : f32 to vector<4x32xf32>
    %256 = arith.subf %255, %249 : vector<4x32xf32>
    %257 = arith.mulf %256, %254 : vector<4x32xf32>
    %258 = arith.mulf %249, %217 : vector<4x32xf32>
    %259 = arith.addf %257, %258 : vector<4x32xf32>
    %c6_i32 = arith.constant 6 : i32
    %260 = arith.index_cast %c6_i32 : i32 to index
    %c0_88 = arith.constant 0 : index
    %c0_89 = arith.constant 0 : index
    %261 = vector.load %arg2[%260, %c0_88, %c0_89] : memref<8x4x96xbf16, #tpu.memory_space<vmem>>, vector<1x4x32xbf16>
    %262 = vector.shape_cast %261 : vector<1x4x32xbf16> to vector<4x32xbf16>
    %263 = arith.extf %262 : vector<4x32xbf16> to vector<4x32xf32>
    %264 = arith.index_cast %c6_i32 : i32 to index
    %c0_90 = arith.constant 0 : index
    %c32_91 = arith.constant 32 : index
    %265 = vector.load %arg2[%264, %c0_90, %c32_91] : memref<8x4x96xbf16, #tpu.memory_space<vmem>>, vector<1x4x32xbf16>
    %266 = vector.shape_cast %265 : vector<1x4x32xbf16> to vector<4x32xbf16>
    %267 = arith.extf %266 : vector<4x32xbf16> to vector<4x32xf32>
    %268 = arith.index_cast %c6_i32 : i32 to index
    %c0_92 = arith.constant 0 : index
    %c64_93 = arith.constant 64 : index
    %269 = vector.load %arg2[%268, %c0_92, %c64_93] : memref<8x4x96xbf16, #tpu.memory_space<vmem>>, vector<1x4x32xbf16>
    %270 = vector.shape_cast %269 : vector<1x4x32xbf16> to vector<4x32xbf16>
    %271 = arith.extf %270 : vector<4x32xbf16> to vector<4x32xf32>
    %272 = arith.truncf %259 : vector<4x32xf32> to vector<4x32xbf16>
    %cst_94 = arith.constant dense<0.000000e+00> : vector<4x96xf32>
    %273 = tpu.matmul %272, %3, %cst_94 {dimension_numbers = #tpu.dot_dimension_numbers<[1], [0], [0], [1], [0, 0, 1, 1], [], []>} : vector<4x32xbf16>, vector<32x96xbf16>, vector<4x96xf32> -> vector<4x96xf32>
    %274 = vector.extract_strided_slice %273 {offsets = [0, 0], sizes = [4, 32], strides = [1, 1]} : vector<4x96xf32> to vector<4x32xf32>
    %275 = arith.addf %263, %274 : vector<4x32xf32>
    %cst_95 = arith.constant 5.000000e-01 : f32
    %276 = vector.broadcast %cst_95 : f32 to vector<4x32xf32>
    %277 = arith.mulf %276, %275 : vector<4x32xf32>
    %278 = math.tanh %277 : vector<4x32xf32>
    %cst_96 = arith.constant 5.000000e-01 : f32
    %279 = vector.broadcast %cst_96 : f32 to vector<4x32xf32>
    %280 = arith.mulf %279, %278 : vector<4x32xf32>
    %cst_97 = arith.constant 5.000000e-01 : f32
    %281 = vector.broadcast %cst_97 : f32 to vector<4x32xf32>
    %282 = arith.addf %280, %281 : vector<4x32xf32>
    %283 = vector.extract_strided_slice %273 {offsets = [0, 32], sizes = [4, 32], strides = [1, 1]} : vector<4x96xf32> to vector<4x32xf32>
    %284 = arith.addf %267, %283 : vector<4x32xf32>
    %cst_98 = arith.constant 5.000000e-01 : f32
    %285 = vector.broadcast %cst_98 : f32 to vector<4x32xf32>
    %286 = arith.mulf %285, %284 : vector<4x32xf32>
    %287 = math.tanh %286 : vector<4x32xf32>
    %cst_99 = arith.constant 5.000000e-01 : f32
    %288 = vector.broadcast %cst_99 : f32 to vector<4x32xf32>
    %289 = arith.mulf %288, %287 : vector<4x32xf32>
    %cst_100 = arith.constant 5.000000e-01 : f32
    %290 = vector.broadcast %cst_100 : f32 to vector<4x32xf32>
    %291 = arith.addf %289, %290 : vector<4x32xf32>
    %292 = vector.extract_strided_slice %273 {offsets = [0, 64], sizes = [4, 32], strides = [1, 1]} : vector<4x96xf32> to vector<4x32xf32>
    %293 = arith.addf %292, %6 : vector<4x32xf32>
    %294 = arith.mulf %282, %293 : vector<4x32xf32>
    %295 = arith.addf %271, %294 : vector<4x32xf32>
    %296 = math.tanh %295 : vector<4x32xf32>
    %cst_101 = arith.constant 1.000000e+00 : f32
    %297 = vector.broadcast %cst_101 : f32 to vector<4x32xf32>
    %298 = arith.subf %297, %291 : vector<4x32xf32>
    %299 = arith.mulf %298, %296 : vector<4x32xf32>
    %300 = arith.mulf %291, %259 : vector<4x32xf32>
    %301 = arith.addf %299, %300 : vector<4x32xf32>
    %c7_i32 = arith.constant 7 : i32
    %302 = arith.index_cast %c7_i32 : i32 to index
    %c0_102 = arith.constant 0 : index
    %c0_103 = arith.constant 0 : index
    %303 = vector.load %arg2[%302, %c0_102, %c0_103] : memref<8x4x96xbf16, #tpu.memory_space<vmem>>, vector<1x4x32xbf16>
    %304 = vector.shape_cast %303 : vector<1x4x32xbf16> to vector<4x32xbf16>
    %305 = arith.extf %304 : vector<4x32xbf16> to vector<4x32xf32>
    %306 = arith.index_cast %c7_i32 : i32 to index
    %c0_104 = arith.constant 0 : index
    %c32_105 = arith.constant 32 : index
    %307 = vector.load %arg2[%306, %c0_104, %c32_105] : memref<8x4x96xbf16, #tpu.memory_space<vmem>>, vector<1x4x32xbf16>
    %308 = vector.shape_cast %307 : vector<1x4x32xbf16> to vector<4x32xbf16>
    %309 = arith.extf %308 : vector<4x32xbf16> to vector<4x32xf32>
    %310 = arith.index_cast %c7_i32 : i32 to index
    %c0_106 = arith.constant 0 : index
    %c64_107 = arith.constant 64 : index
    %311 = vector.load %arg2[%310, %c0_106, %c64_107] : memref<8x4x96xbf16, #tpu.memory_space<vmem>>, vector<1x4x32xbf16>
    %312 = vector.shape_cast %311 : vector<1x4x32xbf16> to vector<4x32xbf16>
    %313 = arith.extf %312 : vector<4x32xbf16> to vector<4x32xf32>
    %314 = arith.truncf %301 : vector<4x32xf32> to vector<4x32xbf16>
    %cst_108 = arith.constant dense<0.000000e+00> : vector<4x96xf32>
    %315 = tpu.matmul %314, %3, %cst_108 {dimension_numbers = #tpu.dot_dimension_numbers<[1], [0], [0], [1], [0, 0, 1, 1], [], []>} : vector<4x32xbf16>, vector<32x96xbf16>, vector<4x96xf32> -> vector<4x96xf32>
    %316 = vector.extract_strided_slice %315 {offsets = [0, 0], sizes = [4, 32], strides = [1, 1]} : vector<4x96xf32> to vector<4x32xf32>
    %317 = arith.addf %305, %316 : vector<4x32xf32>
    %cst_109 = arith.constant 5.000000e-01 : f32
    %318 = vector.broadcast %cst_109 : f32 to vector<4x32xf32>
    %319 = arith.mulf %318, %317 : vector<4x32xf32>
    %320 = math.tanh %319 : vector<4x32xf32>
    %cst_110 = arith.constant 5.000000e-01 : f32
    %321 = vector.broadcast %cst_110 : f32 to vector<4x32xf32>
    %322 = arith.mulf %321, %320 : vector<4x32xf32>
    %cst_111 = arith.constant 5.000000e-01 : f32
    %323 = vector.broadcast %cst_111 : f32 to vector<4x32xf32>
    %324 = arith.addf %322, %323 : vector<4x32xf32>
    %325 = vector.extract_strided_slice %315 {offsets = [0, 32], sizes = [4, 32], strides = [1, 1]} : vector<4x96xf32> to vector<4x32xf32>
    %326 = arith.addf %309, %325 : vector<4x32xf32>
    %cst_112 = arith.constant 5.000000e-01 : f32
    %327 = vector.broadcast %cst_112 : f32 to vector<4x32xf32>
    %328 = arith.mulf %327, %326 : vector<4x32xf32>
    %329 = math.tanh %328 : vector<4x32xf32>
    %cst_113 = arith.constant 5.000000e-01 : f32
    %330 = vector.broadcast %cst_113 : f32 to vector<4x32xf32>
    %331 = arith.mulf %330, %329 : vector<4x32xf32>
    %cst_114 = arith.constant 5.000000e-01 : f32
    %332 = vector.broadcast %cst_114 : f32 to vector<4x32xf32>
    %333 = arith.addf %331, %332 : vector<4x32xf32>
    %334 = vector.extract_strided_slice %315 {offsets = [0, 64], sizes = [4, 32], strides = [1, 1]} : vector<4x96xf32> to vector<4x32xf32>
    %335 = arith.addf %334, %6 : vector<4x32xf32>
    %336 = arith.mulf %324, %335 : vector<4x32xf32>
    %337 = arith.addf %313, %336 : vector<4x32xf32>
    %338 = math.tanh %337 : vector<4x32xf32>
    %cst_115 = arith.constant 1.000000e+00 : f32
    %339 = vector.broadcast %cst_115 : f32 to vector<4x32xf32>
    %340 = arith.subf %339, %333 : vector<4x32xf32>
    %341 = arith.mulf %340, %338 : vector<4x32xf32>
    %342 = arith.mulf %333, %301 : vector<4x32xf32>
    %343 = arith.addf %341, %342 : vector<4x32xf32>
    %c8_i32 = arith.constant 8 : i32
    %c0_116 = arith.constant 0 : index
    %c0_117 = arith.constant 0 : index
    %344 = vector.load %arg10[%c0_116, %c0_117] : memref<4x32xf32, #tpu.memory_space<vmem>>, vector<4x32xf32>
    tpu.vector_store %arg10[%c0_116, %c0_117], %343 {strides = array<i32>} : memref<4x32xf32, #tpu.memory_space<vmem>>, vector<4x32xf32>,
    %c0_i32_118 = arith.constant 0 : i32
    %345 = arith.cmpi eq, %arg1, %c0_i32_118 : i32
    %346 = arith.extui %345 : i1 to i32
    %c0_i32_119 = arith.constant 0 : i32
    %347 = arith.cmpi ne, %346, %c0_i32_119 : i32
    scf.if %347 {
      %c0_120 = arith.constant 0 : index
      %c0_121 = arith.constant 0 : index
      %348 = vector.load %arg10[%c0_120, %c0_121] : memref<4x32xf32, #tpu.memory_space<vmem>>, vector<4x32xf32>
      %c0_122 = arith.constant 0 : index
      %c0_123 = arith.constant 0 : index
      %349 = vector.load %arg5[%c0_122, %c0_123] : memref<32x50xf32, #tpu.memory_space<vmem>>, vector<32x50xf32>
      %cst_124 = arith.constant dense<0.000000e+00> : vector<4x50xf32>
      %350 = tpu.matmul %348, %349, %cst_124 {dimension_numbers = #tpu.dot_dimension_numbers<[1], [0], [0], [1], [0, 0, 1, 1], [], []>} : vector<4x32xf32>, vector<32x50xf32>, vector<4x50xf32> -> vector<4x50xf32>
      %c0_125 = arith.constant 0 : index
      %c0_126 = arith.constant 0 : index
      %351 = vector.load %arg6[%c0_125, %c0_126] : memref<1x50xf32, #tpu.memory_space<vmem>>, vector<1x50xf32>
      %352 = vector.broadcast %351 : vector<1x50xf32> to vector<4x50xf32>
      %353 = arith.addf %350, %352 : vector<4x50xf32>
      %354 = math.tanh %353 : vector<4x50xf32>
      %c0_127 = arith.constant 0 : index
      %c0_128 = arith.constant 0 : index
      %355 = vector.load %arg7[%c0_127, %c0_128] : memref<50x32xf32, #tpu.memory_space<vmem>>, vector<50x32xf32>
      %cst_129 = arith.constant dense<0.000000e+00> : vector<4x32xf32>
      %356 = tpu.matmul %354, %355, %cst_129 {dimension_numbers = #tpu.dot_dimension_numbers<[1], [0], [0], [1], [0, 0, 1, 1], [], []>} : vector<4x50xf32>, vector<50x32xf32>, vector<4x32xf32> -> vector<4x32xf32>
      %c0_130 = arith.constant 0 : index
      %c0_131 = arith.constant 0 : index
      %357 = vector.load %arg8[%c0_130, %c0_131] : memref<1x32xf32, #tpu.memory_space<vmem>>, vector<1x32xf32>
      %358 = vector.broadcast %357 : vector<1x32xf32> to vector<4x32xf32>
      %359 = arith.addf %356, %358 : vector<4x32xf32>
      %c0_132 = arith.constant 0 : index
      %c0_133 = arith.constant 0 : index
      %360 = vector.load %arg9[%c0_132, %c0_133] : memref<4x32xf32, #tpu.memory_space<vmem>>, vector<4x32xf32>
      tpu.vector_store %arg9[%c0_132, %c0_133], %359 {strides = array<i32>} : memref<4x32xf32, #tpu.memory_space<vmem>>, vector<4x32xf32>,
    } else {
    }
    return
  }
  func.func @transform_0(%arg0: i32, %arg1: i32) -> (i32, i32, i32) {
    %c0_i32 = arith.constant 0 : i32
    %c0_i32_0 = arith.constant 0 : i32
    return %arg1, %arg0, %c0_i32 : i32, i32, i32
  }
  func.func @transform_1(%arg0: i32, %arg1: i32) -> (i32, i32) {
    %c0_i32 = arith.constant 0 : i32
    %c0_i32_0 = arith.constant 0 : i32
    %c0_i32_1 = arith.constant 0 : i32
    return %c0_i32, %c0_i32_0 : i32, i32
  }
  func.func @transform_2(%arg0: i32, %arg1: i32) -> (i32, i32) {
    %c0_i32 = arith.constant 0 : i32
    %c0_i32_0 = arith.constant 0 : i32
    %c0_i32_1 = arith.constant 0 : i32
    return %c0_i32, %c0_i32_0 : i32, i32
  }
  func.func @transform_3(%arg0: i32, %arg1: i32) -> (i32, i32) {
    %c0_i32 = arith.constant 0 : i32
    %c0_i32_0 = arith.constant 0 : i32
    %c0_i32_1 = arith.constant 0 : i32
    return %c0_i32, %c0_i32_0 : i32, i32
  }
  func.func @transform_4(%arg0: i32, %arg1: i32) -> (i32, i32) {
    %c0_i32 = arith.constant 0 : i32
    %c0_i32_0 = arith.constant 0 : i32
    %c0_i32_1 = arith.constant 0 : i32
    return %c0_i32, %c0_i32_0 : i32, i32
  }
  func.func @transform_5(%arg0: i32, %arg1: i32) -> (i32, i32) {
    %c0_i32 = arith.constant 0 : i32
    %c0_i32_0 = arith.constant 0 : i32
    %c0_i32_1 = arith.constant 0 : i32
    return %c0_i32, %c0_i32_0 : i32, i32
  }
  func.func @transform_6(%arg0: i32, %arg1: i32) -> (i32, i32) {
    %c0_i32 = arith.constant 0 : i32
    %c0_i32_0 = arith.constant 0 : i32
    %c0_i32_1 = arith.constant 0 : i32
    return %c0_i32, %c0_i32_0 : i32, i32
  }
  func.func @transform_7(%arg0: i32, %arg1: i32) -> (i32, i32) {
    %c0_i32 = arith.constant 0 : i32
    %c0_i32_0 = arith.constant 0 : i32
    return %arg0, %c0_i32 : i32, i32
  }
}

</mosaic_0001>

<bundles_post_ra>
// kernel: encoder_z0_rnn_forward.1
= control target key start
LH: loop header
LB: loop body
LE: loop exit
PB: predicated region body
PF: predicated region fallthrough
CT: control target
= control target key end

     0   :  { %vm31_vm0 = vcmask 257024   ;;  %v1045_v0 = vmov 0.0   ;;  %vm1046_vm1 = vmmov 0   ;;  %s1047_s30 = smov 64   ;;  %vm59_vm2 = vcmask 261120   ;;  %s1049_s9 = smov 96   ;;  %s1288_s1 = inlined_call_operand.vmem [shape: bf16[32,96], index: 1, kind: input, shape index: {}]   ;;  %s1289_s2 = inlined_call_operand.vmem [shape: f32[1,32], index: 2, kind: input, shape index: {}]   ;;  %s1290_s0 = inlined_call_operand.vmem [shape: bf16[8,4,96], index: 0, kind: input, shape index: {}]   ;;  %s1291_s3 = inlined_call_operand.vmem [shape: f32[32,50], index: 3, kind: input, shape index: {}]   ;;  %s1292_s5 = inlined_call_operand.vmem [shape: f32[50,32], index: 5, kind: input, shape index: {}]   ;;  %s1293_s4 = inlined_call_operand.vmem [shape: f32[1,50], index: 4, kind: input, shape index: {}]   ;;  %s1294_s6 = inlined_call_operand.vmem [shape: f32[1,32], index: 6, kind: input, shape index: {}]   ;;  %s1295_s7 = inlined_call_operand.vmem [shape: f32[4,32], index: 7, kind: output, shape index: {}]  }
   0x1   :  { %912 = vmatprep.subr.bf16.mxu0 %v1045_v0  ;;  %v1094_v1 = vld [vmem:[%s1288_s1 + $0x8] sm:$0xff]   ;;  %916 = vmatprep.mubr.msk.bf16.mxu0 %vm1046_vm1, %v1045_v0  ;;  %32 = vst.msk [vmem:[#allocation2] sm:$0xf] %vm31_vm0, %v1045_v0  ;;  %v1107_v2 = vld [vmem:[%s1288_s1] sm:$0xff]   ;;  %s1048_s1 = smov 32   ;;  %vm773_vm3 = vcmask 1041408  }
   0x2   :  { %920 = vmatprep.subr.bf16.mxu1 %v1045_v0  ;;  %924 = vmatprep.mubr.msk.bf16.mxu1 %vm1046_vm1, %v1045_v0  ;;  %v852_v3 = vld [vmem:[%s1289_s2] ss:$0 sm:$0xff]  ;;  %v856_v37 = vld [vmem:[%s1290_s0 + $0x2] sm:$0x3]  ;;  %v858_v61 = vld [vmem:[%s1290_s0 + $0x4] sm:$0x3] }
   0x3   :  { %913 = vmatpush3.bf16.msra.mxu0 %v1094_v1  ;;  %921 = vmatpush3.bf16.msra.mxu1 %v1094_v1  ;;  %v44_v12 = vld [vmem:[%s1290_s0] sm:$0x3]  ;;  %v137_v38 = vunpack.c.l.bf16 %v856_v37  ;;  %v212_v62 = vunpack.c.l.bf16 %v858_v61  ;;  %vm769_vm4 = vcmask 408576  }
   0x4   :  { %914 = vmatprep.subr.bf16.mxu0 %v1045_v0  ;;  %108 = vrot.lane.b32.xlu0 %v852_v3, %s1047_s30  ;;  %v45_v13 = vunpack.c.l.bf16 %v44_v12 }
   0x5   :  { %922 = vmatprep.subr.bf16.mxu1 %v1045_v0 }
   0x7   :  { %915 = vmatpush3.bf16.msra.mxu0 %v1107_v2  ;;  %923 = vmatpush3.bf16.msra.mxu1 %v1107_v2 }
   0x8   :  { %v43_v4 = vld [vmem:[#allocation2] sm:$0xf]  ;;  %928 = vmatprep.subr.bf16.mxu0 %v1045_v0  ;;  %936 = vmatprep.subr.bf16.mxu1 %v1045_v0 }
   0x9   :  { %v46_v5 = vpack.c.bf16 %v43_v4, %v43_v4 }
   0xb   :  { %917 = vmatmul.mubr.msk.bf16.vlgmr.msra.gmra.mxu0 %vm59_vm2, %v46_v5 }
   0xc   :  { %929 = vmatpush3.bf16.msra.mxu0 %v1094_v1  ;;  %932 = vmatprep.mubr.msk.bf16.mxu0 %vm1046_vm1, %v1045_v0 }
   0xd   :  { %930 = vmatprep.subr.bf16.mxu0 %v1045_v0 }
  0x10   :  { %931 = vmatpush3.bf16.msra.mxu0 %v1107_v2 }
  0x11   :  { %944 = vmatprep.subr.bf16.mxu0 %v1045_v0 }
  0x76   :  { %v1127_v6 = vpop.permute.xlu0 %108 }
  0xcb   :  { %v97_v7 = vpop.f32.mrf.mxu0 }
  0xcc   :  { %v111_v8 = vadd.f32 %v1127_v6, %v97_v7  ;;  %v103_v14 = vadd.f32 %v97_v7, %v45_v13 }
  0xcd   :  { %v918_v9 = vpop.f32.mrf.mxu0 }
  0xce   :  { %113 = vrot.lane.b32.xlu0 %v111_v8, %s1047_s30  ;;  %v104_v15 = vmul.f32 0.5, %v103_v14 }
  0xcf   :  { %v100_v10 = vpop.f32.mrf.mxu0 }
  0xd0   :  { %1011 = vtanh.f32 %v104_v15 }
  0xd1   :  { %v919_v11 = vpop.f32.mrf.mxu0 }
  0xd2   :  { %130 = vrot.lane.b32.xlu0 %v43_v4, %s1048_s1 }
  0xdd   :  { %v1012_v16 = vpop.eup %1011 }
  0xde   :  { %v106_v17 = vmul.f32 0.5, %v1012_v16 }
  0xe0   :  { %v107_v18 = vadd.f32 0.5, %v106_v17 }
  0xe2   :  { %v123_v25 = vsub.f32 1.0, %v107_v18 }
 0x140   :  { %v114_v19 = vpop.permute.xlu0 %113 }
 0x141   :  { %v116_v20 = vmul.f32 %v114_v19, %v107_v18 }
 0x143   :  { %118 = vrot.lane.b32.xlu1 %v116_v20, %s1047_s30 }
 0x144   :  { %v131_v24 = vpop.permute.xlu0 %130 }
 0x145   :  { %v133_v27 = vmul.f32 %v131_v24, %v107_v18 }
 0x1b5   :  { %v119_v21 = vpop.permute.xlu1 %118 }
 0x1b6   :  { %v121_v22 = vadd.f32 %v119_v21, %v45_v13 }
 0x1b8   :  { %1013 = vtanh.f32 %v121_v22 }
 0x1c5   :  { %v1014_v23 = vpop.eup %1013 }
 0x1c6   :  { %125 = vrot.lane.b32.xlu1 %v1014_v23, %s1049_s9 }
 0x238   :  { %v126_v26 = vpop.permute.xlu1 %125 }
 0x239   :  { %v128_v28 = vmul.f32 %v126_v26, %v123_v25  ;;  %v860_v25 = vld [vmem:[%s1290_s0 + $0x6] sm:$0x3] }
 0x23a   :  { %v287_v26 = vunpack.c.l.bf16 %v860_v25 }
 0x23b   :  { %v134_v29 = vadd.f32 %v133_v27, %v128_v28 }
 0x23d   :  { %v138_v30 = vpack.c.bf16 %v134_v29, %v134_v29 }
 0x23f   :  { %140 = vrot.lane.b32.xlu1 %v138_v30, %s1049_s9 }
 0x2b1   :  { %v141_v31 = vpop.permute.xlu1 %140 }
 0x2b2   :  { %925 = vmatmul.mubr.msk.bf16.vlgmr.msra.gmra.mxu1 %vm59_vm2, %v141_v31 }
 0x2b3   :  { %937 = vmatpush3.bf16.msra.mxu1 %v1094_v1  ;;  %940 = vmatprep.mubr.msk.bf16.mxu1 %vm1046_vm1, %v1045_v0 }
 0x2b4   :  { %938 = vmatprep.subr.bf16.mxu1 %v1045_v0 }
 0x2b7   :  { %939 = vmatpush3.bf16.msra.mxu1 %v1107_v2 }
 0x2b8   :  { %952 = vmatprep.subr.bf16.mxu1 %v1045_v0 }
 0x372   :  { %v179_v32 = vpop.f32.mrf.mxu1 }
 0x373   :  { %v190_v33 = vadd.f32 %v179_v32, %v1127_v6  ;;  %v185_v39 = vadd.f32 %v179_v32, %v137_v38 }
 0x374   :  { %v926_v34 = vpop.f32.mrf.mxu1 }
 0x375   :  { %192 = vrot.lane.b32.xlu0 %v190_v33, %s1047_s30  ;;  %v186_v40 = vmul.f32 0.5, %v185_v39 }
 0x376   :  { %v182_v35 = vpop.f32.mrf.mxu1 }
 0x377   :  { %1015 = vtanh.f32 %v186_v40 }
 0x378   :  { %v927_v36 = vpop.f32.mrf.mxu1 }
 0x384   :  { %v1016_v41 = vpop.eup %1015 }
 0x385   :  { %v188_v42 = vmul.f32 0.5, %v1016_v41 }
 0x387   :  { %v189_v43 = vadd.f32 0.5, %v188_v42 }
 0x389   :  { %v202_v49 = vsub.f32 1.0, %v189_v43  ;;  %v208_v51 = vmul.f32 %v189_v43, %v134_v29 }
 0x3e7   :  { %v193_v44 = vpop.permute.xlu0 %192 }
 0x3e8   :  { %v195_v45 = vmul.f32 %v193_v44, %v189_v43 }
 0x3ea   :  { %197 = vrot.lane.b32.xlu1 %v195_v45, %s1047_s30 }
 0x45c   :  { %v198_v46 = vpop.permute.xlu1 %197 }
 0x45d   :  { %v200_v47 = vadd.f32 %v198_v46, %v137_v38 }
 0x45f   :  { %1017 = vtanh.f32 %v200_v47 }
 0x46c   :  { %v1018_v48 = vpop.eup %1017 }
 0x46d   :  { %204 = vrot.lane.b32.xlu0 %v1018_v48, %s1049_s9 }
 0x4df   :  { %v205_v50 = vpop.permute.xlu0 %204 }
 0x4e0   :  { %v207_v52 = vmul.f32 %v205_v50, %v202_v49  ;;  %v862_v49 = vld [vmem:[%s1290_s0 + $0x8] sm:$0x3] }
 0x4e1   :  { %v362_v50 = vunpack.c.l.bf16 %v862_v49 }
 0x4e2   :  { %v209_v53 = vadd.f32 %v208_v51, %v207_v52 }
 0x4e4   :  { %v213_v54 = vpack.c.bf16 %v209_v53, %v209_v53 }
 0x4e6   :  { %215 = vrot.lane.b32.xlu1 %v213_v54, %s1049_s9 }
 0x558   :  { %v216_v55 = vpop.permute.xlu1 %215 }
 0x559   :  { %933 = vmatmul.mubr.msk.bf16.vlgmr.msra.gmra.mxu0 %vm59_vm2, %v216_v55 }
 0x55a   :  { %945 = vmatpush3.bf16.msra.mxu0 %v1094_v1  ;;  %948 = vmatprep.mubr.msk.bf16.mxu0 %vm1046_vm1, %v1045_v0 }
 0x55b   :  { %946 = vmatprep.subr.bf16.mxu0 %v1045_v0 }
 0x55e   :  { %947 = vmatpush3.bf16.msra.mxu0 %v1107_v2 }
 0x55f   :  { %960 = vmatprep.subr.bf16.mxu0 %v1045_v0 }
 0x619   :  { %v254_v56 = vpop.f32.mrf.mxu0 }
 0x61a   :  { %v265_v57 = vadd.f32 %v254_v56, %v1127_v6  ;;  %v260_v63 = vadd.f32 %v254_v56, %v212_v62 }
 0x61b   :  { %v934_v58 = vpop.f32.mrf.mxu0 }
 0x61c   :  { %267 = vrot.lane.b32.xlu0 %v265_v57, %s1047_s30  ;;  %v261_v3 = vmul.f32 0.5, %v260_v63 }
 0x61d   :  { %v257_v59 = vpop.f32.mrf.mxu0 }
 0x61e   :  { %1019 = vtanh.f32 %v261_v3 }
 0x61f   :  { %v935_v60 = vpop.f32.mrf.mxu0 }
 0x62b   :  { %v1020_v4 = vpop.eup %1019 }
 0x62c   :  { %v263_v5 = vmul.f32 0.5, %v1020_v4 }
 0x62e   :  { %v264_v7 = vadd.f32 0.5, %v263_v5 }
 0x630   :  { %v277_v13 = vsub.f32 1.0, %v264_v7  ;;  %v283_v15 = vmul.f32 %v264_v7, %v209_v53 }
 0x68e   :  { %v268_v8 = vpop.permute.xlu0 %267 }
 0x68f   :  { %v270_v9 = vmul.f32 %v268_v8, %v264_v7 }
 0x691   :  { %272 = vrot.lane.b32.xlu1 %v270_v9, %s1047_s30 }
 0x703   :  { %v273_v10 = vpop.permute.xlu1 %272 }
 0x704   :  { %v275_v11 = vadd.f32 %v273_v10, %v212_v62 }
 0x706   :  { %1021 = vtanh.f32 %v275_v11 }
 0x713   :  { %v1022_v12 = vpop.eup %1021 }
 0x714   :  { %279 = vrot.lane.b32.xlu0 %v1022_v12, %s1049_s9 }
 0x786   :  { %v280_v14 = vpop.permute.xlu0 %279 }
 0x787   :  { %v282_v16 = vmul.f32 %v280_v14, %v277_v13 }
 0x789   :  { %v284_v17 = vadd.f32 %v283_v15, %v282_v16 }
 0x78b   :  { %v288_v18 = vpack.c.bf16 %v284_v17, %v284_v17 }
 0x78d   :  { %290 = vrot.lane.b32.xlu1 %v288_v18, %s1049_s9 }
 0x7ff   :  { %v291_v19 = vpop.permute.xlu1 %290 }
 0x800   :  { %941 = vmatmul.mubr.msk.bf16.vlgmr.msra.gmra.mxu1 %vm59_vm2, %v291_v19 }
 0x801   :  { %953 = vmatpush3.bf16.msra.mxu1 %v1094_v1  ;;  %956 = vmatprep.mubr.msk.bf16.mxu1 %vm1046_vm1, %v1045_v0 }
 0x802   :  { %954 = vmatprep.subr.bf16.mxu1 %v1045_v0 }
 0x805   :  { %955 = vmatpush3.bf16.msra.mxu1 %v1107_v2 }
 0x806   :  { %968 = vmatprep.subr.bf16.mxu1 %v1045_v0 }
 0x8c0   :  { %v329_v20 = vpop.f32.mrf.mxu1 }
 0x8c1   :  { %v340_v21 = vadd.f32 %v329_v20, %v1127_v6  ;;  %v335_v27 = vadd.f32 %v329_v20, %v287_v26 }
 0x8c2   :  { %v942_v22 = vpop.f32.mrf.mxu1 }
 0x8c3   :  { %342 = vrot.lane.b32.xlu0 %v340_v21, %s1047_s30  ;;  %v336_v28 = vmul.f32 0.5, %v335_v27 }
 0x8c4   :  { %v332_v23 = vpop.f32.mrf.mxu1 }
 0x8c5   :  { %1023 = vtanh.f32 %v336_v28 }
 0x8c6   :  { %v943_v24 = vpop.f32.mrf.mxu1 }
 0x8d2   :  { %v1024_v29 = vpop.eup %1023 }
 0x8d3   :  { %v338_v30 = vmul.f32 0.5, %v1024_v29 }
 0x8d5   :  { %v339_v31 = vadd.f32 0.5, %v338_v30 }
 0x8d7   :  { %v352_v37 = vsub.f32 1.0, %v339_v31  ;;  %v358_v39 = vmul.f32 %v339_v31, %v284_v17 }
 0x935   :  { %v343_v32 = vpop.permute.xlu0 %342 }
 0x936   :  { %v345_v33 = vmul.f32 %v343_v32, %v339_v31 }
 0x938   :  { %347 = vrot.lane.b32.xlu1 %v345_v33, %s1047_s30 }
 0x9aa   :  { %v348_v34 = vpop.permute.xlu1 %347 }
 0x9ab   :  { %v350_v35 = vadd.f32 %v348_v34, %v287_v26 }
 0x9ad   :  { %1025 = vtanh.f32 %v350_v35  ;;  %v866_v35 = vld [vmem:[%s1290_s0 + $0xc] sm:$0x3] }
 0x9ba   :  { %v1026_v36 = vpop.eup %1025 }
 0x9bb   :  { %354 = vrot.lane.b32.xlu0 %v1026_v36, %s1049_s9  ;;  %v512_v36 = vunpack.c.l.bf16 %v866_v35 }
 0xa2d   :  { %v355_v38 = vpop.permute.xlu0 %354 }
 0xa2e   :  { %v357_v40 = vmul.f32 %v355_v38, %v352_v37 }
 0xa30   :  { %v359_v41 = vadd.f32 %v358_v39, %v357_v40 }
 0xa32   :  { %v363_v42 = vpack.c.bf16 %v359_v41, %v359_v41 }
 0xa34   :  { %365 = vrot.lane.b32.xlu1 %v363_v42, %s1049_s9 }
 0xaa6   :  { %v366_v43 = vpop.permute.xlu1 %365 }
 0xaa7   :  { %949 = vmatmul.mubr.msk.bf16.vlgmr.msra.gmra.mxu0 %vm59_vm2, %v366_v43 }
 0xaa8   :  { %961 = vmatpush3.bf16.msra.mxu0 %v1094_v1  ;;  %964 = vmatprep.mubr.msk.bf16.mxu0 %vm1046_vm1, %v1045_v0 }
 0xaa9   :  { %962 = vmatprep.subr.bf16.mxu0 %v1045_v0 }
 0xaac   :  { %963 = vmatpush3.bf16.msra.mxu0 %v1107_v2 }
 0xaad   :  { %976 = vmatprep.subr.mxu0 %v1045_v0 }
 0xb67   :  { %v404_v44 = vpop.f32.mrf.mxu0 }
 0xb68   :  { %v415_v45 = vadd.f32 %v404_v44, %v1127_v6  ;;  %v410_v51 = vadd.f32 %v404_v44, %v362_v50 }
 0xb69   :  { %v950_v46 = vpop.f32.mrf.mxu0 }
 0xb6a   :  { %417 = vrot.lane.b32.xlu0 %v415_v45, %s1047_s30  ;;  %v411_v52 = vmul.f32 0.5, %v410_v51 }
 0xb6b   :  { %v407_v47 = vpop.f32.mrf.mxu0 }
 0xb6c   :  { %1027 = vtanh.f32 %v411_v52 }
 0xb6d   :  { %v951_v48 = vpop.f32.mrf.mxu0 }
 0xb79   :  { %v1028_v53 = vpop.eup %1027 }
 0xb7a   :  { %v413_v54 = vmul.f32 0.5, %v1028_v53 }
 0xb7c   :  { %v414_v55 = vadd.f32 0.5, %v413_v54 }
 0xb7e   :  { %v427_v61 = vsub.f32 1.0, %v414_v55  ;;  %v433_v63 = vmul.f32 %v414_v55, %v359_v41 }
 0xbdc   :  { %v418_v56 = vpop.permute.xlu0 %417 }
 0xbdd   :  { %v420_v57 = vmul.f32 %v418_v56, %v414_v55 }
 0xbdf   :  { %422 = vrot.lane.b32.xlu1 %v420_v57, %s1047_s30 }
 0xc51   :  { %v423_v58 = vpop.permute.xlu1 %422 }
 0xc52   :  { %v425_v59 = vadd.f32 %v423_v58, %v362_v50 }
 0xc54   :  { %1029 = vtanh.f32 %v425_v59  ;;  %v868_v59 = vld [vmem:[%s1290_s0 + $0xe] sm:$0x3] }
 0xc61   :  { %v1030_v60 = vpop.eup %1029 }
 0xc62   :  { %429 = vrot.lane.b32.xlu0 %v1030_v60, %s1049_s9  ;;  %v587_v60 = vunpack.c.l.bf16 %v868_v59 }
 0xcd4   :  { %v430_v62 = vpop.permute.xlu0 %429 }
 0xcd5   :  { %v432_v3 = vmul.f32 %v430_v62, %v427_v61 }
 0xcd7   :  { %v434_v4 = vadd.f32 %v433_v63, %v432_v3 }
 0xcd9   :  { %v438_v5 = vpack.c.bf16 %v434_v4, %v434_v4 }
 0xcdb   :  { %440 = vrot.lane.b32.xlu1 %v438_v5, %s1049_s9 }
 0xd4d   :  { %v441_v7 = vpop.permute.xlu1 %440 }
 0xd4e   :  { %957 = vmatmul.mubr.msk.bf16.vlgmr.msra.gmra.mxu1 %vm59_vm2, %v441_v7 }
 0xd4f   :  { %969 = vmatpush3.bf16.msra.mxu1 %v1094_v1  ;;  %972 = vmatprep.mubr.msk.bf16.mxu1 %vm1046_vm1, %v1045_v0  ;;  %v864_v1 = vld [vmem:[%s1290_s0 + $0xa] sm:$0x3] }
 0xd50   :  { %970 = vmatprep.subr.bf16.mxu1 %v1045_v0  ;;  %v437_v13 = vunpack.c.l.bf16 %v864_v1  ;;  %v670_v1 = vld [vmem:[%s1291_s3] sm:$0xff] }
 0xd53   :  { %971 = vmatpush3.bf16.msra.mxu1 %v1107_v2 }
 0xd54   :  { %987 = vmatprep.subr.mxu1 %v1045_v0 }
 0xe0e   :  { %v479_v8 = vpop.f32.mrf.mxu1 }
 0xe0f   :  { %v490_v9 = vadd.f32 %v479_v8, %v1127_v6  ;;  %v485_v14 = vadd.f32 %v479_v8, %v437_v13 }
 0xe10   :  { %v958_v10 = vpop.f32.mrf.mxu1 }
 0xe11   :  { %492 = vrot.lane.b32.xlu0 %v490_v9, %s1047_s30  ;;  %v486_v15 = vmul.f32 0.5, %v485_v14  ;;  %v673_v10 = vld [vmem:[%s1291_s3 + $0x18] sm:$0xff] }
 0xe12   :  { %v482_v11 = vpop.f32.mrf.mxu1 }
 0xe13   :  { %1031 = vtanh.f32 %v486_v15  ;;  %v672_v11 = vld [vmem:[%s1291_s3 + $0x10] sm:$0xff] }
 0xe14   :  { %v959_v12 = vpop.f32.mrf.mxu1 }
 0xe15   :  { %v671_v12 = vld [vmem:[%s1291_s3 + $0x8] sm:$0xff] }
 0xe20   :  { %v1032_v16 = vpop.eup %1031 }
 0xe21   :  { %v488_v2 = vmul.f32 0.5, %v1032_v16 }
 0xe23   :  { %v489_v17 = vadd.f32 0.5, %v488_v2 }
 0xe25   :  { %v502_v23 = vsub.f32 1.0, %v489_v17  ;;  %v508_v25 = vmul.f32 %v489_v17, %v434_v4 }
 0xe83   :  { %v493_v18 = vpop.permute.xlu0 %492 }
 0xe84   :  { %v495_v19 = vmul.f32 %v493_v18, %v489_v17 }
 0xe86   :  { %497 = vrot.lane.b32.xlu1 %v495_v19, %s1047_s30  ;;  %v761_v19 = vld [vmem:[%s1292_s5 + $0x30] sm:$0x3] }
 0xef8   :  { %v498_v20 = vpop.permute.xlu1 %497 }
 0xef9   :  { %v500_v21 = vadd.f32 %v498_v20, %v437_v13  ;;  %v760_v20 = vld [vmem:[%s1292_s5 + $0x28] sm:$0xff] }
 0xefb   :  { %1033 = vtanh.f32 %v500_v21  ;;  %v759_v21 = vld [vmem:[%s1292_s5 + $0x20] sm:$0xff] }
 0xf08   :  { %v1034_v22 = vpop.eup %1033 }
 0xf09   :  { %504 = vrot.lane.b32.xlu0 %v1034_v22, %s1049_s9  ;;  %v758_v22 = vld [vmem:[%s1292_s5 + $0x18] sm:$0xff] }
 0xf7b   :  { %v505_v24 = vpop.permute.xlu0 %504 }
 0xf7c   :  { %v507_v26 = vmul.f32 %v505_v24, %v502_v23  ;;  %v757_v23 = vld [vmem:[%s1292_s5 + $0x10] sm:$0xff]  ;;  %v756_v24 = vld [vmem:[%s1292_s5 + $0x8] sm:$0xff] }
 0xf7e   :  { %v509_v27 = vadd.f32 %v508_v25, %v507_v26  ;;  %v755_v25 = vld [vmem:[%s1292_s5] sm:$0xff] }
 0xf7f   :  { %v870_v26 = vld [vmem:[%s1293_s4] ss:$0 sm:$0xff] }
 0xf80   :  { %v513_v28 = vpack.c.bf16 %v509_v27, %v509_v27 }
 0xf82   :  { %515 = vrot.lane.b32.xlu1 %v513_v28, %s1049_s9 }
 0xff4   :  { %v516_v29 = vpop.permute.xlu1 %515 }
 0xff5   :  { %965 = vmatmul.mubr.msk.bf16.vlgmr.msra.gmra.mxu0 %vm59_vm2, %v516_v29 }
 0xff6   :  { %984 = vmatprep.mubr.msk.f32.mxu0 %vm1046_vm1, %v1045_v0  ;;  %977 = vmatpush3.msra.mxu0 %v673_v10 }
 0xff7   :  { %978 = vmatprep.subr.mxu0 %v1045_v0 }
 0xff8   :  { %979 = vmatpush3.msra.mxu0 %v672_v11 }
 0xff9   :  { %980 = vmatprep.subr.mxu0 %v1045_v0 }
 0xffa   :  { %981 = vmatpush3.msra.mxu0 %v671_v12 }
 0xffb   :  { %982 = vmatprep.subr.mxu0 %v1045_v0 }
 0xffc   :  { %983 = vmatpush3.msra.mxu0 %v670_v1 }
0x10b5   :  { %v554_v30 = vpop.f32.mrf.mxu0 }
0x10b6   :  { %v565_v31 = vadd.f32 %v554_v30, %v1127_v6  ;;  %v560_v37 = vadd.f32 %v554_v30, %v512_v36 }
0x10b7   :  { %v966_v32 = vpop.f32.mrf.mxu0 }
0x10b8   :  { %567 = vrot.lane.b32.xlu0 %v565_v31, %s1047_s30  ;;  %v561_v38 = vmul.f32 0.5, %v560_v37  ;;  %v872_v31 = vld [vmem:[%s1294_s6] ss:$0 sm:$0xff] }
0x10b9   :  { %v557_v33 = vpop.f32.mrf.mxu0 }
0x10ba   :  { %1035 = vtanh.f32 %v561_v38 }
0x10bb   :  { %v967_v34 = vpop.f32.mrf.mxu0 }
0x10c7   :  { %v1036_v39 = vpop.eup %1035 }
0x10c8   :  { %v563_v40 = vmul.f32 0.5, %v1036_v39 }
0x10ca   :  { %v564_v41 = vadd.f32 0.5, %v563_v40 }
0x10cc   :  { %v577_v47 = vsub.f32 1.0, %v564_v41  ;;  %v583_v49 = vmul.f32 %v564_v41, %v509_v27 }
0x112a   :  { %v568_v42 = vpop.permute.xlu0 %567 }
0x112b   :  { %v570_v43 = vmul.f32 %v568_v42, %v564_v41 }
0x112d   :  { %572 = vrot.lane.b32.xlu1 %v570_v43, %s1047_s30 }
0x119f   :  { %v573_v44 = vpop.permute.xlu1 %572 }
0x11a0   :  { %v575_v45 = vadd.f32 %v573_v44, %v512_v36 }
0x11a2   :  { %1037 = vtanh.f32 %v575_v45 }
0x11af   :  { %v1038_v46 = vpop.eup %1037 }
0x11b0   :  { %579 = vrot.lane.b32.xlu0 %v1038_v46, %s1049_s9 }
0x1222   :  { %v580_v48 = vpop.permute.xlu0 %579 }
0x1223   :  { %v582_v50 = vmul.f32 %v580_v48, %v577_v47 }
0x1225   :  { %v584_v51 = vadd.f32 %v583_v49, %v582_v50 }
0x1227   :  { %v588_v52 = vpack.c.bf16 %v584_v51, %v584_v51 }
0x1229   :  { %590 = vrot.lane.b32.xlu1 %v588_v52, %s1049_s9 }
0x129b   :  { %v591_v53 = vpop.permute.xlu1 %590 }
0x129c   :  { %973 = vmatmul.mubr.msk.bf16.vlgmr.msra.gmra.mxu1 %vm59_vm2, %v591_v53 }
0x129d   :  { %1001 = vmatprep.mubr.msk.f32.mxu1 %vm1046_vm1, %v1045_v0  ;;  %988 = vmatpush3.msk.msra.mxu1 %vm773_vm3, %v761_v19 }
0x129e   :  { %989 = vmatprep.subr.mxu1 %v1045_v0 }
0x129f   :  { %990 = vmatpush3.msra.mxu1 %v760_v20 }
0x12a0   :  { %991 = vmatprep.subr.mxu1 %v1045_v0 }
0x12a1   :  { %992 = vmatpush3.msra.mxu1 %v759_v21 }
0x12a2   :  { %993 = vmatprep.subr.mxu1 %v1045_v0 }
0x12a3   :  { %994 = vmatpush3.msra.mxu1 %v758_v22 }
0x12a4   :  { %995 = vmatprep.subr.mxu1 %v1045_v0 }
0x12a5   :  { %996 = vmatpush3.msra.mxu1 %v757_v23 }
0x12a6   :  { %997 = vmatprep.subr.mxu1 %v1045_v0 }
0x12a7   :  { %998 = vmatpush3.msra.mxu1 %v756_v24 }
0x12a8   :  { %999 = vmatprep.subr.mxu1 %v1045_v0 }
0x12a9   :  { %1000 = vmatpush3.msra.mxu1 %v755_v25 }
0x135c   :  { %v629_v54 = vpop.f32.mrf.mxu1 }
0x135d   :  { %v640_v55 = vadd.f32 %v629_v54, %v1127_v6  ;;  %v635_v61 = vadd.f32 %v629_v54, %v587_v60 }
0x135e   :  { %v974_v56 = vpop.f32.mrf.mxu1 }
0x135f   :  { %642 = vrot.lane.b32.xlu0 %v640_v55, %s1047_s30  ;;  %v636_v62 = vmul.f32 0.5, %v635_v61 }
0x1360   :  { %v632_v57 = vpop.f32.mrf.mxu1 }
0x1361   :  { %1039 = vtanh.f32 %v636_v62 }
0x1362   :  { %v975_v58 = vpop.f32.mrf.mxu1 }
0x136e   :  { %v1040_v63 = vpop.eup %1039 }
0x136f   :  { %v638_v3 = vmul.f32 0.5, %v1040_v63 }
0x1371   :  { %v639_v4 = vadd.f32 0.5, %v638_v3 }
0x1373   :  { %v652_v13 = vsub.f32 1.0, %v639_v4  ;;  %v658_v15 = vmul.f32 %v639_v4, %v584_v51 }
0x13d1   :  { %v643_v5 = vpop.permute.xlu0 %642 }
0x13d2   :  { %v645_v7 = vmul.f32 %v643_v5, %v639_v4 }
0x13d4   :  { %647 = vrot.lane.b32.xlu1 %v645_v7, %s1047_s30 }
0x1446   :  { %v648_v6 = vpop.permute.xlu1 %647 }
0x1447   :  { %v650_v8 = vadd.f32 %v648_v6, %v587_v60 }
0x1449   :  { %1041 = vtanh.f32 %v650_v8 }
0x1456   :  { %v1042_v9 = vpop.eup %1041 }
0x1457   :  { %654 = vrot.lane.b32.xlu0 %v1042_v9, %s1049_s9 }
0x14c9   :  { %v655_v14 = vpop.permute.xlu0 %654 }
0x14ca   :  { %v657_v16 = vmul.f32 %v655_v14, %v652_v13 }
0x14cc   :  { %v659_v2 = vadd.f32 %v658_v15, %v657_v16 }
0x14ce   :  { %661 = vrot.lane.b32.xlu1 %v659_v2, %s1049_s9 }
0x1540   :  { %v662_v17 = vpop.permute.xlu1 %661 }
0x1541   :  { %665 = vst.msk [vmem:[#allocation2] sm:$0xf] %vm31_vm0, %v662_v17 }
0x1548   :  { %v669_v18 = vld [vmem:[#allocation2] sm:$0xf] }
0x1549   :  { %985 = vmatmul.mubr.msk.f32.vlgmr.msra.gmra.mxu0 %vm59_vm2, %v669_v18 }
0x1609   :  { %v750_v27 = vpop.f32.mrf.mxu0 }
0x160a   :  { %v751_v28 = vadd.f32 %v870_v26, %v750_v27 }
0x160b   :  { %v986_v29 = vpop.f32.mrf.mxu0 }
0x160c   :  { %1043 = vtanh.f32 %v751_v28 }
0x1619   :  { %v1044_v30 = vpop.eup %1043 }
0x161a   :  { %1002 = vmatmul.mubr.msk.f32.vlgmr.msra.gmra.mxu1 %vm769_vm4, %v1044_v30 }
0x16da   :  { %v843_v32 = vpop.f32.mrf.mxu1 }
0x16db   :  { %v844_v33 = vadd.f32 %v872_v31, %v843_v32 }
0x16dc   :  { %v1003_v34 = vpop.f32.mrf.mxu1 }
0x16dd   :  { %847 = vst.msk [vmem:[%s1295_s7] sm:$0xf] %vm31_vm0, %v844_v33 }

</bundles_post_ra>
